<compile_context>
chip_gen: v5e
topology: v5e:2x2
jax: 0.10.0
libtpu: 0.0.40
codegen_flags: <defaults>
</compile_context>

<pallas_src>
import functools

import jax
import jax.numpy as jnp
from jax.experimental import pallas as pl
from jax.experimental.pallas import tpu as pltpu


def _mce_kernel(logits_ref, tgt_ref, mask_ref, w_ref, out_ref, *, n_rows):
    """One row-tile: masked, class-weighted NLL partial sums -> (1, 128) row.

    out row: lane 0 = sum(mask*w[t]*nll) over this tile, lane 1 = sum(mask*w[t]).
    """
    tm = logits_ref.shape[0]
    i = pl.program_id(0)

    # Row-validity predicate for the ragged last tile (logits are NOT padded in
    # HBM, so the tail of the last block is garbage and must be neutralized
    # before any transcendental).
    row = jax.lax.broadcasted_iota(jnp.int32, (tm, 1), 0) + i * tm
    valid = row < n_rows                                        # (tm, 1) bool

    x = logits_ref[...].astype(jnp.float32)                     # (tm, C)
    x = jnp.where(valid, x, 0.0)                                # kill garbage rows

    # numerically-stable log-sum-exp
    m = jnp.max(x, axis=-1, keepdims=True)                      # (tm, 1)
    lse = jnp.log(jnp.sum(jnp.exp(x - m), axis=-1, keepdims=True)) + m

    # fused target gather: logit[target] and weight[target] via masked lane sums
    tgt = tgt_ref[...]                                          # (tm, 1) int32
    cls = jax.lax.broadcasted_iota(jnp.int32, x.shape, 1)       # (tm, C)
    hit = cls == tgt                                            # (tm, C) bool
    picked = jnp.sum(jnp.where(hit, x, 0.0), axis=-1, keepdims=True)        # (tm,1)
    w_row = jnp.sum(jnp.where(hit, w_ref[...], 0.0), axis=-1, keepdims=True)  # (tm,1)

    msk = jnp.where(valid, mask_ref[...], 0.0)                  # (tm, 1)
    wm = w_row * msk
    nll = lse - picked                                          # -log_softmax[t]

    num = jnp.sum(nll * wm)                                     # tile partials
    den = jnp.sum(wm)

    lane = jax.lax.broadcasted_iota(jnp.int32, (1, 128), 1)
    out_ref[...] = jnp.where(lane == 0, num, jnp.where(lane == 1, den, 0.0))


def _choose_tm(n_rows, num_classes):
    """Row tile sized so the f32 compute tile stays ~2 MiB (safe on v5e/v6e/v7x)."""
    tm = (2 * 1024 * 1024) // max(num_classes * 4, 1)
    tm = max(8, min(2048, tm))
    tm = (tm // 8) * 8
    if n_rows >= 8:
        tm = min(tm, (n_rows // 8) * 8)
    else:
        tm = n_rows  # single full-array block
    return max(tm, 1)


def masked_cross_entropy_loss(logits, targets, mask, class_weights=None, tm=None):
    """logits: (..., C); targets: (...) int; mask: (...) bool -> scalar loss."""
    C = logits.shape[-1]
    logits_flat = logits.reshape(-1, C)                 # keep native dtype (no f32 copy)
    N = logits_flat.shape[0]
    targets_flat = targets.reshape(N, 1).astype(jnp.int32)
    mask_flat = mask.reshape(N, 1).astype(jnp.float32)

    if class_weights is None:
        class_weights = jnp.ones((C,), jnp.float32)
    w = class_weights.reshape(1, C).astype(jnp.float32)

    if tm is None:
        tm = _choose_tm(N, C)
    nblocks = pl.cdiv(N, tm)

    kernel = functools.partial(_mce_kernel, n_rows=N)

    partials = pl.pallas_call(
        kernel,
        out_shape=jax.ShapeDtypeStruct((nblocks, 128), jnp.float32),
        grid_spec=pltpu.PrefetchScalarGridSpec(
            num_scalar_prefetch=0,
            grid=(nblocks,),
            in_specs=[
                pl.BlockSpec((tm, C), lambda i: (i, 0)),   # logits tile (native dtype)
                pl.BlockSpec((tm, 1), lambda i: (i, 0)),   # targets tile
                pl.BlockSpec((tm, 1), lambda i: (i, 0)),   # mask tile
                pl.BlockSpec((1, C), lambda i: (0, 0)),    # class weights (resident)
            ],
            out_specs=pl.BlockSpec((1, 128), lambda i: (i, 0)),  # per-block partials
        ),
        compiler_params=pltpu.CompilerParams(
            dimension_semantics=("parallel",),       # independent blocks -> v7x megacore
            vmem_limit_bytes=48 * 1024 * 1024,       # safe on v5e/v6e (128 MiB) & v7x (64 MiB)
        ),
    )(logits_flat, targets_flat, mask_flat, w)

    num = jnp.sum(partials[:, 0])
    den = jnp.sum(partials[:, 1])
    # den == 0 (everything masked out) yields NaN, matching torch's behavior
    # for an empty selection.
    return num / den


def _reference(logits, targets, mask, class_weights):
    """Pure-JAX reference matching F.cross_entropy(..., weight=w) semantics."""
    C = logits.shape[-1]
    lf = logits.reshape(-1, C).astype(jnp.float32)
    tf = targets.reshape(-1).astype(jnp.int32)
    mf = mask.reshape(-1).astype(jnp.float32)
    logp = jax.nn.log_softmax(lf, axis=-1)
    nll = -jnp.take_along_axis(logp, tf[:, None], axis=-1)[:, 0]
    w = class_weights[tf]
    return jnp.sum(nll * w * mf) / jnp.sum(w * mf)


if __name__ == "__main__":
    key = jax.random.PRNGKey(0)
    k1, k2, k3 = jax.random.split(key, 3)

    batch, seq, num_classes = 2, 8, 6       # logits (2, 8, 6), targets/mask (2, 8)
    logits = jax.random.normal(k1, (batch, seq, num_classes), dtype=jnp.float32)
    targets = jax.random.randint(k2, (batch, seq), 0, num_classes, dtype=jnp.int32)
    mask = jax.random.uniform(k3, (batch, seq)) > 0.3       # boolean mask

    # deterministic per-class weights (the module's optional `weights` param)
    class_weights = jnp.linspace(0.5, 1.5, num_classes, dtype=jnp.float32)

    loss = masked_cross_entropy_loss(logits, targets, mask, class_weights)
    loss = jax.block_until_ready(loss)

    ref = _reference(logits, targets, mask, class_weights)
    assert jnp.allclose(loss, ref, rtol=1e-5, atol=1e-5), (loss, ref)

    print("KERNEL_OK")
</pallas_src>

<mosaic_0001>
module attributes {stable_mosaic.version = 11 : i64} {
  func.func @_mce_kernel(%arg0: i32, %arg1: memref<16x6xf32, #tpu.memory_space<vmem>>, %arg2: memref<16x1xi32, #tpu.memory_space<vmem>>, %arg3: memref<16x1xf32, #tpu.memory_space<vmem>>, %arg4: memref<1x6xf32, #tpu.memory_space<vmem>>, %arg5: memref<1x128xf32, #tpu.memory_space<vmem>>) attributes {dimension_semantics = [#tpu.dimension_semantics<parallel>], iteration_bounds = array<i64: 1>, scalar_prefetch = 0 : i64, scratch_operands = 0 : i64, tpu.core_type = #tpu.core_type<tc>, window_params = [{transform_indices = @transform_0, window_bounds = array<i64: 16, 6>}, {transform_indices = @transform_1, window_bounds = array<i64: 16, 1>}, {transform_indices = @transform_2, window_bounds = array<i64: 16, 1>}, {pipeline_mode = #tpu.pipeline_mode<synchronous>, transform_indices = @transform_3, window_bounds = array<i64: 1, 6>}, {transform_indices = @transform_4, window_bounds = array<i64: 1, 128>}]} {
    %0 = tpu.iota {dimensions = array<i32: 0>} : vector<16x1xi32>
    %c16_i32 = arith.constant 16 : i32
    %1 = arith.muli %arg0, %c16_i32 : i32
    %2 = vector.broadcast %1 : i32 to vector<16x1xi32>
    %3 = arith.addi %0, %2 : vector<16x1xi32>
    %c16_i32_0 = arith.constant 16 : i32
    %4 = vector.broadcast %c16_i32_0 : i32 to vector<16x1xi32>
    %5 = arith.cmpi slt, %3, %4 : vector<16x1xi32>
    %c0 = arith.constant 0 : index
    %c0_1 = arith.constant 0 : index
    %6 = vector.load %arg1[%c0, %c0_1] : memref<16x6xf32, #tpu.memory_space<vmem>>, vector<16x6xf32>
    %cst = arith.constant 0.000000e+00 : f32
    %7 = vector.shape_cast %5 : vector<16x1xi1> to vector<16x1xi1>
    %8 = vector.broadcast %7 : vector<16x1xi1> to vector<16x6xi1>
    %9 = vector.broadcast %cst : f32 to vector<16x6xf32>
    %10 = arith.select %8, %6, %9 : vector<16x6xi1>, vector<16x6xf32>
    %cst_2 = arith.constant dense<0xFF800000> : vector<16xf32>
    %11 = vector.multi_reduction <maximumf>, %10, %cst_2 [1] : vector<16x6xf32> to vector<16xf32>
    %12 = vector.shape_cast %11 : vector<16xf32> to vector<16x1xf32>
    %13 = vector.broadcast %12 : vector<16x1xf32> to vector<16x6xf32>
    %14 = arith.subf %10, %13 : vector<16x6xf32>
    %15 = math.exp %14 : vector<16x6xf32>
    %cst_3 = arith.constant dense<0.000000e+00> : vector<16xf32>
    %16 = vector.multi_reduction <add>, %15, %cst_3 [1] : vector<16x6xf32> to vector<16xf32>
    %17 = vector.shape_cast %16 : vector<16xf32> to vector<16x1xf32>
    %18 = math.log %17 : vector<16x1xf32>
    %19 = arith.addf %18, %12 : vector<16x1xf32>
    %c0_4 = arith.constant 0 : index
    %c0_5 = arith.constant 0 : index
    %20 = vector.load %arg2[%c0_4, %c0_5] : memref<16x1xi32, #tpu.memory_space<vmem>>, vector<16x1xi32>
    %21 = tpu.iota {dimensions = array<i32: 1>} : vector<16x6xi32>
    %22 = vector.broadcast %20 : vector<16x1xi32> to vector<16x6xi32>
    %23 = arith.cmpi eq, %21, %22 : vector<16x6xi32>
    %cst_6 = arith.constant 0.000000e+00 : f32
    %24 = vector.broadcast %cst_6 : f32 to vector<16x6xf32>
    %25 = arith.select %23, %10, %24 : vector<16x6xi1>, vector<16x6xf32>
    %cst_7 = arith.constant dense<0.000000e+00> : vector<16xf32>
    %26 = vector.multi_reduction <add>, %25, %cst_7 [1] : vector<16x6xf32> to vector<16xf32>
    %27 = vector.shape_cast %26 : vector<16xf32> to vector<16x1xf32>
    %c0_8 = arith.constant 0 : index
    %c0_9 = arith.constant 0 : index
    %28 = vector.load %arg4[%c0_8, %c0_9] : memref<1x6xf32, #tpu.memory_space<vmem>>, vector<1x6xf32>
    %cst_10 = arith.constant 0.000000e+00 : f32
    %29 = vector.shape_cast %28 : vector<1x6xf32> to vector<1x6xf32>
    %30 = vector.broadcast %29 : vector<1x6xf32> to vector<16x6xf32>
    %31 = vector.broadcast %cst_10 : f32 to vector<16x6xf32>
    %32 = arith.select %23, %30, %31 : vector<16x6xi1>, vector<16x6xf32>
    %cst_11 = arith.constant dense<0.000000e+00> : vector<16xf32>
    %33 = vector.multi_reduction <add>, %32, %cst_11 [1] : vector<16x6xf32> to vector<16xf32>
    %34 = vector.shape_cast %33 : vector<16xf32> to vector<16x1xf32>
    %c0_12 = arith.constant 0 : index
    %c0_13 = arith.constant 0 : index
    %35 = vector.load %arg3[%c0_12, %c0_13] : memref<16x1xf32, #tpu.memory_space<vmem>>, vector<16x1xf32>
    %cst_14 = arith.constant 0.000000e+00 : f32
    %36 = vector.broadcast %cst_14 : f32 to vector<16x1xf32>
    %37 = arith.select %5, %35, %36 : vector<16x1xi1>, vector<16x1xf32>
    %38 = arith.mulf %34, %37 : vector<16x1xf32>
    %39 = arith.subf %19, %27 : vector<16x1xf32>
    %40 = arith.mulf %39, %38 : vector<16x1xf32>
    %41 = vector.shape_cast %40 : vector<16x1xf32> to vector<1x16x1xf32>
    %cst_15 = arith.constant dense<0.000000e+00> : vector<1xf32>
    %42 = vector.multi_reduction <add>, %41, %cst_15 [1, 2] : vector<1x16x1xf32> to vector<1xf32>
    %43 = vector.shape_cast %42 : vector<1xf32> to vector<1x1x1xf32>
    %44 = vector.extract %43[0, 0, 0] : f32 from vector<1x1x1xf32>
    %45 = vector.shape_cast %38 : vector<16x1xf32> to vector<1x16x1xf32>
    %cst_16 = arith.constant dense<0.000000e+00> : vector<1xf32>
    %46 = vector.multi_reduction <add>, %45, %cst_16 [1, 2] : vector<1x16x1xf32> to vector<1xf32>
    %47 = vector.shape_cast %46 : vector<1xf32> to vector<1x1x1xf32>
    %48 = vector.extract %47[0, 0, 0] : f32 from vector<1x1x1xf32>
    %49 = tpu.iota {dimensions = array<i32: 1>} : vector<1x128xi32>
    %c0_i32 = arith.constant 0 : i32
    %50 = vector.broadcast %c0_i32 : i32 to vector<1x128xi32>
    %51 = arith.cmpi eq, %49, %50 : vector<1x128xi32>
    %c1_i32 = arith.constant 1 : i32
    %52 = vector.broadcast %c1_i32 : i32 to vector<1x128xi32>
    %53 = arith.cmpi eq, %49, %52 : vector<1x128xi32>
    %cst_17 = arith.constant 0.000000e+00 : f32
    %54 = vector.broadcast %48 : f32 to vector<1x128xf32>
    %55 = vector.broadcast %cst_17 : f32 to vector<1x128xf32>
    %56 = arith.select %53, %54, %55 : vector<1x128xi1>, vector<1x128xf32>
    %57 = vector.broadcast %44 : f32 to vector<1x128xf32>
    %58 = arith.select %51, %57, %56 : vector<1x128xi1>, vector<1x128xf32>
    %c0_18 = arith.constant 0 : index
    %c0_19 = arith.constant 0 : index
    %59 = vector.load %arg5[%c0_18, %c0_19] : memref<1x128xf32, #tpu.memory_space<vmem>>, vector<1x128xf32>
    tpu.vector_store %arg5[%c0_18, %c0_19], %58 {strides = array<i32>} : memref<1x128xf32, #tpu.memory_space<vmem>>, vector<1x128xf32>,
    return
  }
  func.func @transform_0(%arg0: i32) -> (i32, i32) {
    %c0_i32 = arith.constant 0 : i32
    %c0_i32_0 = arith.constant 0 : i32
    return %arg0, %c0_i32 : i32, i32
  }
  func.func @transform_1(%arg0: i32) -> (i32, i32) {
    %c0_i32 = arith.constant 0 : i32
    %c0_i32_0 = arith.constant 0 : i32
    return %arg0, %c0_i32 : i32, i32
  }
  func.func @transform_2(%arg0: i32) -> (i32, i32) {
    %c0_i32 = arith.constant 0 : i32
    %c0_i32_0 = arith.constant 0 : i32
    return %arg0, %c0_i32 : i32, i32
  }
  func.func @transform_3(%arg0: i32) -> (i32, i32) {
    %c0_i32 = arith.constant 0 : i32
    %c0_i32_0 = arith.constant 0 : i32
    %c0_i32_1 = arith.constant 0 : i32
    return %c0_i32, %c0_i32_0 : i32, i32
  }
  func.func @transform_4(%arg0: i32) -> (i32, i32) {
    %c0_i32 = arith.constant 0 : i32
    %c0_i32_0 = arith.constant 0 : i32
    return %arg0, %c0_i32 : i32, i32
  }
}

</mosaic_0001>

<bundles_post_ra>
// kernel: tpu_custom_call.1
= control target key start
LH: loop header
LB: loop body
LE: loop exit
PB: predicated region body
PF: predicated region fallthrough
CT: control target
= control target key end

     0   :  { %vm35_vm0 = vcmask 48128   ;;  %v193_v3 = vmov 0   ;;  %s262_s0 = inlined_call_operand.vmem [shape: f32[16,6], index: 0, kind: input, shape index: {}]   ;;  %s263_s1 = inlined_call_operand.vmem [shape: s32[16,1], index: 1, kind: input, shape index: {}]   ;;  %s264_s2 = inlined_call_operand.vmem [shape: f32[16,1], index: 2, kind: input, shape index: {}]   ;;  %s265_s3 = inlined_call_operand.vmem [shape: f32[1,6], index: 3, kind: input, shape index: {}]   ;;  %s266_s4 = inlined_call_operand.hbm [shape: f32[1,128], index: 4, kind: output, shape index: {}]  }
   0x1   :  { %v27_v0 = vld [vmem:[%s262_s0] sm:$0xff]  ;;  %156 = vset.pattern.permute.xlu1 %v193_v3  ;;  %157 = vset.pattern.permute.xlu0 %v193_v3 }
   0x2   :  { %v60_v1 = vld [vmem:[%s263_s1] sm:$0xff]  ;;  %v36_v2 = vsel %vm35_vm0, %v27_v0, -inf }
   0x3   :  { %37 = vmax.xlane.f32.xlu0 %v36_v2  ;;  %65 = vperm.xlu1 %156, %v60_v1  }
   0x4   :  { %9 = vsyncpa [#allocation3], 0  ;;  %v28_v4 = vld [vmem:[%s262_s0 + $0x8] sm:$0xff]  ;;  %v62_v7 = vlaneseq  ;;  %v158_v15 = vld [vmem:[%s265_s3] ss:$0 sm:$0xff]  ;;  %vm102_vm3 = vcmask 7168  }
   0x5   :  { %v39_v5 = vsel %vm35_vm0, %v28_v4, -inf  ;;  %v61_v6 = vld [vmem:[%s263_s1 + $0x8] sm:$0xff]  ;;  %v92_v38 = vld [vmem:[%s264_s2] sm:$0xff]  ;;  %s141_s30 = sshll.u32 %s266_s4, 4  ;;  %s142_s30 = int_to_ptr.hbm [resolvable:$true] %s141_s30 }
   0x6   :  { %v234_v8 = vand.u32 127, %v62_v7  ;;  %v93_v35 = vld [vmem:[%s264_s2 + $0x8] sm:$0xff]  ;;  %s194_s2 = smov [#allocation2]  }
   0x7   :  { %s139_s26 = sshll.u32 %s194_s2, 4  ;;  %s140_s26 = int_to_ptr.vmem [resolvable:$true] %s139_s26 }
   0x8   :  { %vm128_vm4 = vcmp.eq.s32.totalorder %v234_v8, 1  ;;  %vm127_vm5 = vcmp.eq.s32.totalorder %v234_v8, 0 }
   0xb   :  { %40 = vmax.xlane.f32.xlu0 %v39_v5  ;;  %68 = vperm.xlu1 %156, %v61_v6  }
  0x75   :  { %v66_v9 = vpop.permute.xlu1 %65 }
  0x76   :  { %v38_v10 = vpop.xlane.xlu0 %37  ;;  %vm70_vm1 = vcmp.eq.s32.totalorder %v234_v8, %v66_v9 }
  0x77   :  { %v42_v11 = vsub.f32 %v27_v0, %v38_v10  ;;  %v72_v12 = vsel %vm70_vm1, %v27_v0, 0.0  ;;  %v84_v28 = vsel %vm70_vm1, %v158_v15, 0.0 }
  0x78   :  { %v74_v13 = vsel %vm35_vm0, %v72_v12, 0.0  ;;  %v86_v29 = vsel %vm35_vm0, %v84_v28, 0.0 }
  0x79   :  { %v44_v14 = vmul.f32 1.442695, %v42_v11  ;;  %75 = vadd.xlane.f32.xlu0 %v74_v13 }
  0x7b   :  { %159 = vpow2.f32 %v44_v14 }
  0x7d   :  { %v69_v16 = vpop.permute.xlu1 %68 }
  0x7e   :  { %v41_v17 = vpop.xlane.xlu0 %40  ;;  %vm71_vm2 = vcmp.eq.s32.totalorder %v234_v8, %v69_v16 }
  0x7f   :  { %v43_v18 = vsub.f32 %v28_v4, %v41_v17  ;;  %v73_v19 = vsel %vm71_vm2, %v28_v4, 0.0  ;;  %v85_v20 = vsel %vm71_vm2, %v158_v15, 0.0 }
  0x80   :  { %v77_v21 = vsel %vm35_vm0, %v73_v19, 0.0  ;;  %v89_v22 = vsel %vm35_vm0, %v85_v20, 0.0 }
  0x81   :  { %v160_v23 = vpop.eup %159  ;;  %v46_v24 = vmul.f32 1.442695, %v43_v18  ;;  %78 = vadd.xlane.f32.xlu1 %v77_v21  ;;  %90 = vadd.xlane.f32.xlu0 %v89_v22 }
  0x82   :  { %v48_v25 = vsel %vm35_vm0, %v160_v23, 0.0 }
  0x83   :  { %161 = vpow2.f32 %v46_v24  ;;  %49 = vadd.xlane.f32.xlu2 %v48_v25 }
  0x89   :  { %v162_v26 = vpop.eup %161 }
  0x8a   :  { %v51_v27 = vsel %vm35_vm0, %v162_v26, 0.0 }
  0x8b   :  { %52 = vadd.xlane.f32.xlu2 %v51_v27 }
  0x93   :  { %87 = vadd.xlane.f32.xlu2 %v86_v29 }
  0xec   :  { %v76_v31 = vpop.xlane.xlu0 %75 }
  0xf4   :  { %v91_v36 = vpop.xlane.xlu0 %90  ;;  %v79_v46 = vpop.xlane.xlu1 %78 }
  0xf5   :  { %v97_v40 = vmul.f32 %v93_v35, %v91_v36 }
  0xf6   :  { %v50_v30 = vpop.xlane.xlu2 %49 }
  0xf7   :  { %163 = vlog2.f32 %v50_v30  ;;  %v116_v48 = vsel %vm102_vm3, %v97_v40, 0.0 }
  0xfd   :  { %v164_v32 = vpop.eup %163 }
  0xfe   :  { %v53_v33 = vpop.xlane.xlu2 %52  ;;  %v55_v34 = vmul.f32 0.6931472, %v164_v32 }
  0xff   :  { %165 = vlog2.f32 %v53_v33 }
 0x100   :  { %v58_v37 = vadd.f32 %v55_v34, %v38_v10 }
 0x102   :  { %v98_v44 = vsub.f32 %v58_v37, %v76_v31 }
 0x105   :  { %v166_v39 = vpop.eup %165 }
 0x106   :  { %v57_v41 = vmul.f32 0.6931472, %v166_v39  ;;  %v88_v42 = vpop.xlane.xlu2 %87 }
 0x107   :  { %v96_v43 = vmul.f32 %v92_v38, %v88_v42 }
 0x108   :  { %v59_v45 = vadd.f32 %v57_v41, %v41_v17 }
 0x109   :  { %v115_v47 = vsel %vm102_vm3, %v96_v43, 0.0  ;;  %v100_v50 = vmul.f32 %v98_v44, %v96_v43 }
 0x10a   :  { %v99_v49 = vsub.f32 %v59_v45, %v79_v46  ;;  %v117_v51 = vadd.f32 %v116_v48, %v115_v47 }
 0x10b   :  { %v103_v53 = vsel %vm102_vm3, %v100_v50, 0.0 }
 0x10c   :  { %v101_v52 = vmul.f32 %v99_v49, %v97_v40  ;;  %118 = vadd.xlane.f32.xlu0 %v117_v51 }
 0x10e   :  { %v104_v54 = vsel %vm102_vm3, %v101_v52, 0.0 }
 0x10f   :  { %v105_v55 = vadd.f32 %v104_v54, %v103_v53 }
 0x111   :  { %106 = vadd.xlane.f32.xlu2 %v105_v55 }
 0x17f   :  { %v119_v56 = vpop.xlane.xlu0 %118 }
 0x180   :  { %v120_v57 = vrot.slane %v119_v56, 4 }
 0x182   :  { %v121_v58 = vadd.f32 %v120_v57, %v119_v56 }
 0x184   :  { %v122_v59 = vrot.slane %v121_v58, 2  ;;  %v107_v60 = vpop.xlane.xlu2 %106 }
 0x185   :  { %v108_v61 = vrot.slane %v107_v60, 4 }
 0x186   :  { %v123_v63 = vadd.f32 %v122_v59, %v121_v58 }
 0x187   :  { %v109_v62 = vadd.f32 %v108_v61, %v107_v60 }
 0x188   :  { %v124_v2 = vrot.slane %v123_v63, 1 }
 0x189   :  { %v110_v0 = vrot.slane %v109_v62, 2 }
 0x18a   :  { %v125_v5 = vadd.f32 %v124_v2, %v123_v63 }
 0x18b   :  { %v111_v1 = vadd.f32 %v110_v0, %v109_v62 }
 0x18d   :  { %v112_v3 = vrot.slane %v111_v1, 1 }
 0x18f   :  { %v113_v4 = vadd.f32 %v112_v3, %v111_v1 }
 0x191   :  { %150 = vpush %v113_v4 }
 0x192   :  { %152 = vpush %v125_v5 }
 0x1c2   :  { %s151_s27 = spop %150 }
 0x1c3   :  { %v131_v6 = vstv %s151_s27  ;;  %s153_s5 = spop %152 }
 0x1c4   :  { %v129_v7 = vstv %s153_s5 }
 0x1c5   :  { %v130_v9 = vsel %vm128_vm4, %v129_v7, 0.0 }
 0x1c6   :  { %v132_v10 = vsel %vm127_vm5, %v131_v6, %v130_v9 }
 0x1c7   :  { %133 = vst [vmem:[#allocation2] sm:$0x1] %v132_v10 }
 0x1c8   :  { %144 = dma.vmem_to_hbm [thread:$0]  %s140_s26, 16, %s142_s30, [#allocation3]  }
 0x1c9   :  { %191 = dma.done.wait [#allocation3], 16  }
 0x1ca   :  { %192 = vsyncadd [#allocation3], 4294967280 }
 0x1cb   :  { %149 = vsyncpa [#allocation3], 1 }

</bundles_post_ra>
